<compile_context>
chip_gen: v5e
topology: v5e:2x2
jax: 0.10.0
libtpu: 0.0.40
codegen_flags: <defaults>
</compile_context>

<pallas_src>
import jax
import jax.numpy as jnp
from jax.experimental import pallas as pl
from jax.experimental.pallas import tpu as pltpu


def _fusion_kernel(xT_ref, w1_ref, b1_ref, w2_ref, b2_ref, o_ref):
    """One batch tile, transposed layout (batch on lanes).

    xT_ref: [I, TB]  input tile (batch on lanes)
    w1_ref: [H, I]   fc1 weight (PyTorch nn.Linear layout)
    b1_ref: [H, 1]   fc1 bias
    w2_ref: [H, 1]   fc2 weight (transposed PyTorch layout)
    b2_ref: (1,)     fc2 bias, SMEM scalar
    o_ref : [1, TB]  sigmoid output (batch on lanes -> lane-dense stores)
    """
    xT = xT_ref[...]                       # [I, TB]
    w1 = w1_ref[...]                       # [H, I]
    in_size = w1.shape[1]

    # fc1 as `in_size` VPU broadcast-FMAs (K is tiny, MXU would be >99% idle).
    h = b1_ref[...]                        # [H, 1] -> broadcasts against [H, TB]
    for k in range(in_size):               # statically unrolled (in_size = 2)
        h = h + w1[:, k:k + 1] * xT[k:k + 1, :]
    h = jnp.maximum(h, 0.0)                # ReLU                        [H, TB]

    # fc2: elementwise multiply + sublane reduction (VPU + XLU, no MXU).
    y = jnp.sum(h * w2_ref[...], axis=0, keepdims=True) + b2_ref[0]   # [1, TB]

    # Numerically stable sigmoid; single reciprocal rides the EUP slot instead
    # of two f32 divides on the VALU.
    z = jnp.exp(-jnp.abs(y))
    inv = pl.reciprocal(1.0 + z, approx=False)
    o_ref[...] = (jnp.where(y >= 0.0, 1.0, z) * inv).astype(o_ref.dtype)


def _pick_tile(batch, block_b):
    """Lane-dense batch tile (multiple of 128) and padded batch extent."""
    b128 = pl.cdiv(batch, 128) * 128
    tb = max(128, (min(block_b, b128) // 128) * 128)
    b_pad = pl.cdiv(batch, tb) * tb
    return tb, b_pad


def fusion_network_pretransposed(xT, w1, b1, w2, b2, *, block_b=4096):
    """Hot-path entry: x already laid out as [input_size, B_pad] (batch on lanes),
    with B_pad a multiple of the batch tile.  Returns [1, B_pad].

    Use this (with the transpose/pad folded into x's producer) to avoid an extra
    full-input HBM relayout pass per call.
    """
    in_size, b_pad = xT.shape
    hidden = w1.shape[0]
    tb, b_pad_needed = _pick_tile(b_pad, block_b)
    assert b_pad % tb == 0 and b_pad >= b_pad_needed, (b_pad, tb)
    grid = (b_pad // tb,)

    # Per-step VMEM: double-buffered x/out tiles + the [H, tb] f32 intermediate
    # chain (few live copies) + resident weights, with generous headroom.
    # Floor 32 MiB (>= v6e/v7x scoped default, raises v5e's 16 MiB default),
    # cap 48 MiB (safely under v7x's 64 MiB physical VMEM).
    vmem_budget = 4 * tb * (4 * in_size + 4 + 4 * hidden) + (1 << 20)
    vmem_budget = int(min(max(vmem_budget, 32 << 20), 48 << 20))

    b1c = b1.reshape(hidden, 1).astype(jnp.float32)   # [H, 1]
    w2c = w2.reshape(hidden, 1).astype(jnp.float32)   # [H, 1] (== w2.T)
    b2s = b2.reshape(1).astype(jnp.float32)           # (1,) SMEM scalar

    return pl.pallas_call(
        _fusion_kernel,
        out_shape=jax.ShapeDtypeStruct((1, b_pad), jnp.float32),
        grid=grid,
        in_specs=[
            pl.BlockSpec((in_size, tb), lambda i: (0, i)),        # x tile (pipelined)
            pl.BlockSpec((hidden, in_size), lambda i: (0, 0)),    # weights stay resident
            pl.BlockSpec((hidden, 1), lambda i: (0, 0)),
            pl.BlockSpec((hidden, 1), lambda i: (0, 0)),
            pl.BlockSpec(memory_space=pltpu.MemorySpace.SMEM),    # b2 scalar in SMEM
        ],
        out_specs=pl.BlockSpec((1, tb), lambda i: (0, i)),
        compiler_params=pltpu.CompilerParams(
            dimension_semantics=("parallel",),                    # megacore on v7x
            vmem_limit_bytes=vmem_budget,
        ),
    )(xT.astype(jnp.float32), w1.astype(jnp.float32), b1c, w2c, b2s)


def fusion_network(x, w1, b1, w2, b2, *, block_b=4096):
    """Module-compatible forward pass of FusionNetwork.

    x : [B, input_size] float32
    w1: [hidden, input_size]   (PyTorch nn.Linear weight layout)
    b1: [hidden]
    w2: [1, hidden]
    b2: [1]
    returns [B, 1] float32

    Note: this entry performs a one-time transpose+pad of x (batch -> lanes).
    In a real pipeline, fold that relayout into x's producer and call
    `fusion_network_pretransposed` directly.
    """
    B, _ = x.shape
    tb, b_pad = _pick_tile(B, block_b)

    # Transposed layout: batch on lanes.  Padding lanes are garbage-but-finite
    # and sliced off below.
    xT = jnp.pad(x.T.astype(jnp.float32), ((0, 0), (0, b_pad - B)))   # [I, B_pad]

    out_t = fusion_network_pretransposed(xT, w1, b1, w2, b2, block_b=block_b)

    # Back to the module's [B, 1] layout (cheap wrapper-side relayout).
    return out_t[0, :B].reshape(B, 1)


def reference(x, w1, b1, w2, b2):
    h = jnp.maximum(x @ w1.T + b1, 0.0)
    return jax.nn.sigmoid(h @ w2.T + b2)


if __name__ == "__main__":
    input_size = 2
    hidden_size = 128

    key = jax.random.PRNGKey(0)
    kx, kw1, kb1, kw2, kb2, kx2 = jax.random.split(key, 6)

    # Deterministic params in PyTorch nn.Linear layouts.
    w1 = jax.random.normal(kw1, (hidden_size, input_size), dtype=jnp.float32) * 0.1
    b1 = jax.random.normal(kb1, (hidden_size,), dtype=jnp.float32) * 0.1
    w2 = jax.random.normal(kw2, (1, hidden_size), dtype=jnp.float32) * 0.1
    b2 = jax.random.normal(kb2, (1,), dtype=jnp.float32) * 0.1

    # Small batch (single 128-lane tile, mostly padding -> wasted but correct).
    batch = 8
    x = jax.random.normal(kx, (batch, input_size), dtype=jnp.float32)
    out = jax.block_until_ready(fusion_network(x, w1, b1, w2, b2))
    ref = reference(x, w1, b1, w2, b2)
    assert out.shape == (batch, 1), out.shape
    assert jnp.allclose(out, ref, atol=1e-5, rtol=1e-5), (out, ref)

    # Larger (still small) batch with a reduced tile to exercise a multi-step
    # grid plus padding/slicing.
    batch2 = 1000
    x2 = jax.random.normal(kx2, (batch2, input_size), dtype=jnp.float32)
    out2 = jax.block_until_ready(fusion_network(x2, w1, b1, w2, b2, block_b=256))
    ref2 = reference(x2, w1, b1, w2, b2)
    assert out2.shape == (batch2, 1), out2.shape
    assert jnp.allclose(out2, ref2, atol=1e-5, rtol=1e-5), (out2, ref2)

    print("KERNEL_OK")
</pallas_src>

<mosaic_0001>
module attributes {stable_mosaic.version = 11 : i64} {
  func.func @_fusion_kernel(%arg0: i32, %arg1: memref<2x128xf32, #tpu.memory_space<vmem>>, %arg2: memref<128x2xf32, #tpu.memory_space<vmem>>, %arg3: memref<128x1xf32, #tpu.memory_space<vmem>>, %arg4: memref<128x1xf32, #tpu.memory_space<vmem>>, %arg5: memref<1xf32, #tpu.memory_space<smem>>, %arg6: memref<1x128xf32, #tpu.memory_space<vmem>>) attributes {dimension_semantics = [#tpu.dimension_semantics<parallel>], iteration_bounds = array<i64: 1>, scalar_prefetch = 0 : i64, scratch_operands = 0 : i64, tpu.core_type = #tpu.core_type<tc>, window_params = [{transform_indices = @transform_0, window_bounds = array<i64: 2, 128>}, {pipeline_mode = #tpu.pipeline_mode<synchronous>, transform_indices = @transform_1, window_bounds = array<i64: 128, 2>}, {pipeline_mode = #tpu.pipeline_mode<synchronous>, transform_indices = @transform_2, window_bounds = array<i64: 128, 1>}, {pipeline_mode = #tpu.pipeline_mode<synchronous>, transform_indices = @transform_3, window_bounds = array<i64: 128, 1>}, {transform_indices = @transform_4, window_bounds = array<i64: 1>}, {transform_indices = @transform_5, window_bounds = array<i64: 1, 128>}]} {
    %c0 = arith.constant 0 : index
    %c0_0 = arith.constant 0 : index
    %0 = vector.load %arg1[%c0, %c0_0] : memref<2x128xf32, #tpu.memory_space<vmem>>, vector<2x128xf32>
    %c0_1 = arith.constant 0 : index
    %c0_2 = arith.constant 0 : index
    %1 = vector.load %arg2[%c0_1, %c0_2] : memref<128x2xf32, #tpu.memory_space<vmem>>, vector<128x2xf32>
    %c0_3 = arith.constant 0 : index
    %c0_4 = arith.constant 0 : index
    %2 = vector.load %arg3[%c0_3, %c0_4] : memref<128x1xf32, #tpu.memory_space<vmem>>, vector<128x1xf32>
    %3 = vector.extract_strided_slice %1 {offsets = [0, 0], sizes = [128, 1], strides = [1, 1]} : vector<128x2xf32> to vector<128x1xf32>
    %4 = vector.extract_strided_slice %0 {offsets = [0, 0], sizes = [1, 128], strides = [1, 1]} : vector<2x128xf32> to vector<1x128xf32>
    %5 = vector.broadcast %3 : vector<128x1xf32> to vector<128x128xf32>
    %6 = vector.broadcast %4 : vector<1x128xf32> to vector<128x128xf32>
    %7 = arith.mulf %5, %6 : vector<128x128xf32>
    %8 = vector.broadcast %2 : vector<128x1xf32> to vector<128x128xf32>
    %9 = arith.addf %8, %7 : vector<128x128xf32>
    %10 = vector.extract_strided_slice %1 {offsets = [0, 1], sizes = [128, 1], strides = [1, 1]} : vector<128x2xf32> to vector<128x1xf32>
    %11 = vector.extract_strided_slice %0 {offsets = [1, 0], sizes = [1, 128], strides = [1, 1]} : vector<2x128xf32> to vector<1x128xf32>
    %12 = vector.broadcast %10 : vector<128x1xf32> to vector<128x128xf32>
    %13 = vector.broadcast %11 : vector<1x128xf32> to vector<128x128xf32>
    %14 = arith.mulf %12, %13 : vector<128x128xf32>
    %15 = arith.addf %9, %14 : vector<128x128xf32>
    %cst = arith.constant 0.000000e+00 : f32
    %16 = vector.broadcast %cst : f32 to vector<128x128xf32>
    %17 = arith.maximumf %15, %16 : vector<128x128xf32>
    %c0_5 = arith.constant 0 : index
    %c0_6 = arith.constant 0 : index
    %18 = vector.load %arg4[%c0_5, %c0_6] : memref<128x1xf32, #tpu.memory_space<vmem>>, vector<128x1xf32>
    %19 = vector.broadcast %18 : vector<128x1xf32> to vector<128x128xf32>
    %20 = arith.mulf %17, %19 : vector<128x128xf32>
    %cst_7 = arith.constant dense<0.000000e+00> : vector<128xf32>
    %21 = vector.multi_reduction <add>, %20, %cst_7 [0] : vector<128x128xf32> to vector<128xf32>
    %22 = vector.shape_cast %21 : vector<128xf32> to vector<1x128xf32>
    %c0_8 = arith.constant 0 : index
    %23 = memref.load %arg5[%c0_8] : memref<1xf32, #tpu.memory_space<smem>>
    %24 = vector.broadcast %23 : f32 to vector<1x128xf32>
    %25 = arith.addf %22, %24 : vector<1x128xf32>
    %26 = math.absf %25 : vector<1x128xf32>
    %cst_9 = arith.constant 0.000000e+00 : f32
    %27 = vector.broadcast %cst_9 : f32 to vector<1x128xf32>
    %28 = arith.subf %27, %26 : vector<1x128xf32>
    %29 = math.exp %28 : vector<1x128xf32>
    %cst_10 = arith.constant 1.000000e+00 : f32
    %30 = vector.broadcast %cst_10 : f32 to vector<1x128xf32>
    %31 = arith.addf %30, %29 : vector<1x128xf32>
    %32 = tpu.reciprocal %31 : vector<1x128xf32> -> vector<1x128xf32>
    %cst_11 = arith.constant 0.000000e+00 : f32
    %33 = vector.broadcast %cst_11 : f32 to vector<1x128xf32>
    %34 = arith.cmpf oge, %25, %33 : vector<1x128xf32>
    %cst_12 = arith.constant 1.000000e+00 : f32
    %35 = vector.broadcast %cst_12 : f32 to vector<1x128xf32>
    %36 = arith.select %34, %35, %29 : vector<1x128xi1>, vector<1x128xf32>
    %37 = arith.mulf %36, %32 : vector<1x128xf32>
    %c0_13 = arith.constant 0 : index
    %c0_14 = arith.constant 0 : index
    %38 = vector.load %arg6[%c0_13, %c0_14] : memref<1x128xf32, #tpu.memory_space<vmem>>, vector<1x128xf32>
    tpu.vector_store %arg6[%c0_13, %c0_14], %37 {strides = array<i32>} : memref<1x128xf32, #tpu.memory_space<vmem>>, vector<1x128xf32>,
    return
  }
  func.func @transform_0(%arg0: i32) -> (i32, i32) {
    %c0_i32 = arith.constant 0 : i32
    %c0_i32_0 = arith.constant 0 : i32
    return %c0_i32, %arg0 : i32, i32
  }
  func.func @transform_1(%arg0: i32) -> (i32, i32) {
    %c0_i32 = arith.constant 0 : i32
    %c0_i32_0 = arith.constant 0 : i32
    %c0_i32_1 = arith.constant 0 : i32
    return %c0_i32, %c0_i32_0 : i32, i32
  }
  func.func @transform_2(%arg0: i32) -> (i32, i32) {
    %c0_i32 = arith.constant 0 : i32
    %c0_i32_0 = arith.constant 0 : i32
    %c0_i32_1 = arith.constant 0 : i32
    return %c0_i32, %c0_i32_0 : i32, i32
  }
  func.func @transform_3(%arg0: i32) -> (i32, i32) {
    %c0_i32 = arith.constant 0 : i32
    %c0_i32_0 = arith.constant 0 : i32
    %c0_i32_1 = arith.constant 0 : i32
    return %c0_i32, %c0_i32_0 : i32, i32
  }
  func.func @transform_4(%arg0: i32) -> i32 {
    %c0_i32 = arith.constant 0 : i32
    %c0_i32_0 = arith.constant 0 : i32
    return %c0_i32 : i32
  }
  func.func @transform_5(%arg0: i32) -> (i32, i32) {
    %c0_i32 = arith.constant 0 : i32
    %c0_i32_0 = arith.constant 0 : i32
    return %c0_i32, %arg0 : i32, i32
  }
}

</mosaic_0001>

<bundles_post_ra>
// kernel: tpu_custom_call.1
= control target key start
LH: loop header
LB: loop body
LE: loop exit
PB: predicated region body
PF: predicated region fallthrough
CT: control target
= control target key end

     0   :  { %v581_v3 = vmov 1   ;;  %v582_v4 = vmov 0   ;;  %s902_s0 = inlined_call_operand.vmem [shape: f32[2,128], index: 0, kind: input, shape index: {}]   ;;  %s903_s1 = inlined_call_operand.vmem [shape: f32[128,2], index: 1, kind: input, shape index: {}]   ;;  %s904_s2 = inlined_call_operand.vmem [shape: f32[128,1], index: 2, kind: input, shape index: {}]   ;;  %s905_s3 = inlined_call_operand.vmem [shape: f32[128,1], index: 3, kind: input, shape index: {}]   ;;  %s906_s4 = inlined_call_operand.<no memory space> [shape: f32[1], index: 4, kind: input, shape index: {}]   ;;  %s907_s5 = inlined_call_operand.hbm [shape: f32[1,128], index: 5, kind: output, shape index: {}]  }
   0x1   :  { %v617_v0 = vld [vmem:[%s903_s1 + $0x20] sm:$0xff]  ;;  %v622_v1 = vld [vmem:[%s903_s1 + $0x10] sm:$0xff]  ;;  %v24_v2 = vld [vmem:[%s903_s1 + $0x8] sm:$0xff]  ;;  %542 = vset.pattern.permute.xlu0 %v581_v3  ;;  %540 = vset.pattern.permute.xlu2 %v582_v4 }
   0x2   :  { %539 = vset.pattern.permute.xlu1 %v582_v4  ;;  %77 = vperm.xlu2 %540, %v617_v0  }
   0x3   :  { %67 = vperm.xlu1 %539, %v622_v1   ;;  %253 = vperm.xlu0 %542, %v24_v2  }
   0x4   :  { %11 = vsyncpa [#allocation4], 0  ;;  %v635_v5 = vld [vmem:[%s903_s1 + $0x28] sm:$0xff]  ;;  %v26_v6 = vld [vmem:[%s903_s1 + $0x18] sm:$0xff]  ;;  %s527_s15 = sshll.u32 %s907_s5, 4  ;;  %s528_s15 = int_to_ptr.hbm [resolvable:$true] %s527_s15 }
   0x5   :  { %v29_v7 = vld [vmem:[%s903_s1 + $0x30] sm:$0xff]  ;;  %v31_v8 = vld [vmem:[%s903_s1 + $0x40] sm:$0xff]  ;;  %v30_v9 = vld [vmem:[%s903_s1 + $0x38] sm:$0xff] }
   0x6   :  { %v32_v10 = vld [vmem:[%s903_s1 + $0x48] sm:$0xff]  ;;  %v34_v11 = vld [vmem:[%s903_s1 + $0x58] sm:$0xff]  ;;  %v33_v12 = vld [vmem:[%s903_s1 + $0x50] sm:$0xff] }
   0x7   :  { %v36_v13 = vld [vmem:[%s903_s1 + $0x68] sm:$0xff]  ;;  %v665_v14 = vld [vmem:[%s903_s1 + $0x70] sm:$0xff]  ;;  %v23_v15 = vld [vmem:[%s903_s1] sm:$0xff] }
   0x8   :  { %v40_v16 = vld [vmem:[%s904_s2 + $0x8] sm:$0xff]  ;;  %v39_v17 = vld [vmem:[%s904_s2] sm:$0xff]  ;;  %v42_v19 = vld [vmem:[%s904_s2 + $0x18] sm:$0xff] }
   0x9   :  { %v43_v18 = vld [vmem:[%s904_s2 + $0x20] sm:$0xff]  ;;  %v46_v20 = vld [vmem:[%s904_s2 + $0x38] sm:$0xff]  ;;  %v45_v21 = vld [vmem:[%s904_s2 + $0x30] sm:$0xff] }
   0xa   :  { %82 = vperm.xlu2 %540, %v635_v5   ;;  %v49_v22 = vld [vmem:[%s904_s2 + $0x50] sm:$0xff]  ;;  %v48_v23 = vld [vmem:[%s904_s2 + $0x48] sm:$0xff]  ;;  %v699_v24 = vld [vmem:[%s903_s1 + $0x60] sm:$0xff] }
   0xb   :  { %72 = vperm.xlu1 %539, %v26_v6   ;;  %273 = vperm.xlu0 %542, %v29_v7   ;;  %v52_v25 = vld [vmem:[%s904_s2 + $0x68] sm:$0xff]  ;;  %v51_v26 = vld [vmem:[%s904_s2 + $0x60] sm:$0xff]  ;;  %v711_v27 = vld [vmem:[%s903_s1 + $0x78] sm:$0xff] }
   0xc   :  { %v54_v28 = vld [vmem:[%s904_s2 + $0x78] sm:$0xff]  ;;  %v41_v29 = vld [vmem:[%s904_s2 + $0x10] sm:$0xff]  ;;  %v44_v30 = vld [vmem:[%s904_s2 + $0x28] sm:$0xff] }
   0xd   :  { %v47_v32 = vld [vmem:[%s904_s2 + $0x40] sm:$0xff]  ;;  %v50_v34 = vld [vmem:[%s904_s2 + $0x58] sm:$0xff]  ;;  %v53_v36 = vld [vmem:[%s904_s2 + $0x70] sm:$0xff] }
   0xe   :  { %v361_v40 = vld [vmem:[%s905_s3] sm:$0xff]  ;;  %v362_v41 = vld [vmem:[%s905_s3 + $0x8] sm:$0xff]  ;;  %v363_v42 = vld [vmem:[%s905_s3 + $0x10] sm:$0xff] }
   0xf   :  { %v366_v46 = vld [vmem:[%s905_s3 + $0x28] sm:$0xff]  ;;  %v364_v47 = vld [vmem:[%s905_s3 + $0x18] sm:$0xff]  ;;  %v365_v48 = vld [vmem:[%s905_s3 + $0x20] sm:$0xff] }
  0x10   :  { %v22_v52 = vld [vmem:[%s902_s0] sm:$0x3]  ;;  %v367_v55 = vld [vmem:[%s905_s3 + $0x30] sm:$0xff]  ;;  %v368_v56 = vld [vmem:[%s905_s3 + $0x38] sm:$0xff] }
  0x11   :  { %v774_v53 = vperm.slane %v22_v52, 0  ;;  %v369_v54 = vld [vmem:[%s905_s3 + $0x40] sm:$0xff]  ;;  %v370_v63 = vld [vmem:[%s905_s3 + $0x48] sm:$0xff] }
  0x12   :  { %97 = vperm.xlu2 %540, %v31_v8   ;;  %v373_v62 = vld [vmem:[%s905_s3 + $0x60] sm:$0xff] }
  0x13   :  { %92 = vperm.xlu1 %539, %v30_v9   ;;  %285 = vperm.xlu0 %542, %v32_v10  }
  0x1a   :  { %112 = vperm.xlu2 %540, %v34_v11  }
  0x1b   :  { %107 = vperm.xlu1 %539, %v33_v12   ;;  %301 = vperm.xlu0 %542, %v36_v13  }
  0x22   :  { %127 = vperm.xlu2 %540, %v665_v14  }
  0x23   :  { %122 = vperm.xlu1 %539, %v36_v13   ;;  %547 = vset.pattern.permute.xlu0 %v582_v4 }
  0x24   :  { %57 = vperm.xlu0 %547, %v23_v15  }
  0x2a   :  { %159 = vperm.xlu2 %540, %v40_v16  }
  0x2b   :  { %154 = vperm.xlu1 %539, %v39_v17  }
  0x2c   :  { %62 = vperm.xlu0 %547, %v24_v2  }
  0x32   :  { %174 = vperm.xlu2 %540, %v43_v18  }
  0x33   :  { %169 = vperm.xlu1 %539, %v42_v19  }
  0x34   :  { %87 = vperm.xlu0 %547, %v29_v7  }
  0x3a   :  { %189 = vperm.xlu2 %540, %v46_v20  }
  0x3b   :  { %184 = vperm.xlu1 %539, %v45_v21  }
  0x3c   :  { %102 = vperm.xlu0 %547, %v32_v10   ;;  %v371_v10 = vld [vmem:[%s905_s3 + $0x50] sm:$0xff] }
  0x42   :  { %204 = vperm.xlu2 %540, %v49_v22  }
  0x43   :  { %199 = vperm.xlu1 %539, %v48_v23   ;;  %v372_v23 = vld [vmem:[%s905_s3 + $0x58] sm:$0xff] }
  0x44   :  { %117 = vperm.xlu0 %547, %v699_v24  }
  0x4a   :  { %219 = vperm.xlu2 %540, %v52_v25  }
  0x4b   :  { %214 = vperm.xlu1 %539, %v51_v26  }
  0x4c   :  { %132 = vperm.xlu0 %547, %v711_v27  }
  0x52   :  { %541 = vset.pattern.permute.xlu2 %v581_v3 }
  0x53   :  { %229 = vperm.xlu1 %539, %v54_v28   ;;  %249 = vperm.xlu2 %541, %v23_v15  }
  0x54   :  { %164 = vperm.xlu0 %547, %v41_v29  }
  0x5b   :  { %543 = vset.pattern.permute.xlu1 %v581_v3  ;;  %261 = vperm.xlu2 %541, %v26_v6  }
  0x5c   :  { %257 = vperm.xlu1 %543, %v622_v1   ;;  %179 = vperm.xlu0 %547, %v44_v30   ;;  %v78_v31 = vpop.permute.xlu2 %77 }
  0x5d   :  { %v140_v57 = vmul.f32 %v774_v53, %v78_v31  ;;  %v374_v31 = vld [vmem:[%s905_s3 + $0x68] sm:$0xff] }
  0x63   :  { %269 = vperm.xlu2 %541, %v635_v5  }
  0x64   :  { %265 = vperm.xlu1 %543, %v617_v0   ;;  %194 = vperm.xlu0 %547, %v47_v32   ;;  %v731_v33 = vpop.permute.xlu2 %82  ;;  %v375_v32 = vld [vmem:[%s905_s3 + $0x70] sm:$0xff] }
  0x6b   :  { %281 = vperm.xlu2 %541, %v31_v8  }
  0x6c   :  { %277 = vperm.xlu1 %543, %v30_v9   ;;  %209 = vperm.xlu0 %547, %v50_v34   ;;  %v736_v35 = vpop.permute.xlu2 %97 }
  0x73   :  { %293 = vperm.xlu2 %541, %v34_v11   ;;  %v804_v11 = vperm.slane %v22_v52, 1 }
  0x74   :  { %289 = vperm.xlu1 %543, %v33_v12   ;;  %224 = vperm.xlu0 %547, %v53_v36   ;;  %v741_v37 = vpop.permute.xlu2 %112 }
  0x75   :  { %v743_v38 = vpop.permute.xlu1 %67  ;;  %v254_v39 = vpop.permute.xlu0 %253 }
  0x76   :  { %v314_v18 = vmul.f32 %v804_v11, %v254_v39 }
  0x7b   :  { %545 = vset.pattern.permute.xlu2 %v582_v4 }
  0x7c   :  { %544 = vset.pattern.permute.xlu1 %v582_v4  ;;  %379 = vperm.xlu0 %547, %v361_v40   ;;  %v756_v43 = vpop.permute.xlu2 %127 }
  0x7d   :  { %384 = vperm.xlu1 %544, %v362_v41   ;;  %v73_v44 = vpop.permute.xlu1 %72  ;;  %389 = vperm.xlu2 %545, %v363_v42   ;;  %v758_v45 = vpop.permute.xlu0 %273 }
  0x7e   :  { %v139_v22 = vmul.f32 %v774_v53, %v73_v44  ;;  %v319_v36 = vmul.f32 %v804_v11, %v758_v45  ;;  %v376_v44 = vld [vmem:[%s905_s3 + $0x78] sm:$0xff] }
  0x84   :  { %404 = vperm.xlu0 %547, %v366_v46   ;;  %v160_v49 = vpop.permute.xlu2 %159 }
  0x85   :  { %394 = vperm.xlu1 %544, %v364_v47   ;;  %v93_v50 = vpop.permute.xlu1 %92  ;;  %399 = vperm.xlu2 %545, %v365_v48   ;;  %v769_v51 = vpop.permute.xlu0 %285 }
  0x86   :  { %v143_v0 = vmul.f32 %v774_v53, %v93_v50  ;;  %v322_v47 = vmul.f32 %v804_v11, %v769_v51 }
  0x8c   :  { %419 = vperm.xlu0 %547, %v369_v54   ;;  %v175_v58 = vpop.permute.xlu2 %174 }
  0x8d   :  { %v786_v59 = vadd.f32 %v175_v58, %v140_v57  ;;  %409 = vperm.xlu1 %544, %v367_v55   ;;  %v108_v60 = vpop.permute.xlu1 %107  ;;  %414 = vperm.xlu2 %545, %v368_v56   ;;  %v302_v61 = vpop.permute.xlu0 %301 }
  0x8e   :  { %v146_v8 = vmul.f32 %v774_v53, %v108_v60 }
  0x94   :  { %439 = vperm.xlu0 %547, %v373_v62   ;;  %v190_v1 = vpop.permute.xlu2 %189 }
  0x95   :  { %v795_v2 = vadd.f32 %v190_v1, %v143_v0  ;;  %546 = vset.pattern.permute.xlu1 %v581_v3  ;;  %v123_v5 = vpop.permute.xlu1 %122  ;;  %424 = vperm.xlu2 %545, %v370_v63  }
  0x96   :  { %297 = vperm.xlu1 %546, %v699_v24   ;;  %v58_v6 = vpop.permute.xlu0 %57  ;;  %v149_v20 = vmul.f32 %v774_v53, %v123_v5  ;;  %v326_v24 = vmul.f32 %v804_v11, %v302_v61 }
  0x97   :  { %v136_v7 = vmul.f32 %v774_v53, %v58_v6 }
  0x9c   :  { %v205_v9 = vpop.permute.xlu2 %204 }
  0x9d   :  { %v806_v12 = vadd.f32 %v205_v9, %v146_v8  ;;  %v155_v13 = vpop.permute.xlu1 %154  ;;  %549 = vset.pattern.permute.xlu2 %v581_v3 }
  0x9e   :  { %v809_v15 = vadd.f32 %v155_v13, %v136_v7  ;;  %548 = vset.pattern.permute.xlu1 %v582_v4  ;;  %v63_v16 = vpop.permute.xlu0 %62  ;;  %305 = vperm.xlu2 %549, %v665_v14  }
  0x9f   :  { %v137_v17 = vmul.f32 %v774_v53, %v63_v16  ;;  %429 = vperm.xlu1 %548, %v371_v10   ;;  %v138_v16 = vmul.f32 %v774_v53, %v743_v38 }
  0xa1   :  { %v233_v19 = vadd.f32 %v160_v49, %v137_v17 }
  0xa3   :  { %v816_v21 = vadd.f32 %v314_v18, %v233_v19 }
  0xa4   :  { %v220_v3 = vpop.permute.xlu2 %219 }
  0xa5   :  { %v245_v14 = vadd.f32 %v220_v3, %v149_v20  ;;  %v170_v25 = vpop.permute.xlu1 %169 }
  0xa6   :  { %v823_v26 = vadd.f32 %v170_v25, %v139_v22  ;;  %v88_v28 = vpop.permute.xlu0 %87  ;;  %309 = vperm.xlu2 %549, %v711_v27  }
  0xa7   :  { %v826_v29 = vadd.f32 %v326_v24, %v245_v14  ;;  %434 = vperm.xlu1 %548, %v372_v23   ;;  %v142_v30 = vmul.f32 %v774_v53, %v88_v28  ;;  %v346_v24 = vmax.f32 %v816_v21, 0.0 }
  0xad   :  { %v185_v34 = vpop.permute.xlu1 %184  ;;  %v250_v42 = vpop.permute.xlu2 %249 }
  0xae   :  { %v238_v39 = vadd.f32 %v185_v34, %v142_v30  ;;  %v103_v40 = vpop.permute.xlu0 %102  ;;  %550 = vset.pattern.permute.xlu2 %v582_v4  ;;  %v313_v8 = vmul.f32 %v804_v11, %v250_v42  ;;  %v141_v30 = vmul.f32 %v774_v53, %v731_v33  ;;  %v144_v33 = vmul.f32 %v774_v53, %v736_v35 }
  0xaf   :  { %444 = vperm.xlu1 %548, %v374_v31   ;;  %449 = vperm.xlu2 %550, %v375_v32   ;;  %v145_v41 = vmul.f32 %v774_v53, %v103_v40 }
  0xb0   :  { %v838_v27 = vadd.f32 %v319_v36, %v238_v39  ;;  %v329_v18 = vadd.f32 %v313_v8, %v809_v15 }
  0xb2   :  { %v345_v22 = vmax.f32 %v329_v18, 0.0 }
  0xb5   :  { %v200_v46 = vpop.permute.xlu1 %199  ;;  %v262_v50 = vpop.permute.xlu2 %261 }
  0xb6   :  { %v241_v45 = vadd.f32 %v200_v46, %v145_v41  ;;  %v118_v48 = vpop.permute.xlu0 %117  ;;  %v316_v3 = vmul.f32 %v804_v11, %v262_v50 }
  0xb7   :  { %454 = vperm.xlu1 %548, %v376_v44   ;;  %v148_v4 = vmul.f32 %v774_v53, %v118_v48 }
  0xb8   :  { %v846_v49 = vadd.f32 %v322_v47, %v241_v45  ;;  %v332_v15 = vadd.f32 %v316_v3, %v823_v26 }
  0xba   :  { %v348_v44 = vmax.f32 %v332_v15, 0.0 }
  0xbd   :  { %v215_v52 = vpop.permute.xlu1 %214  ;;  %v270_v61 = vpop.permute.xlu2 %269 }
  0xbe   :  { %v849_v54 = vadd.f32 %v215_v52, %v148_v4  ;;  %v133_v55 = vpop.permute.xlu0 %132  ;;  %v318_v40 = vmul.f32 %v804_v11, %v270_v61 }
  0xbf   :  { %v151_v56 = vmul.f32 %v774_v53, %v133_v55 }
  0xc5   :  { %v230_v57 = vpop.permute.xlu1 %229  ;;  %v282_v63 = vpop.permute.xlu2 %281 }
  0xc6   :  { %v852_v58 = vadd.f32 %v230_v57, %v151_v56  ;;  %v165_v60 = vpop.permute.xlu0 %164  ;;  %v321_v57 = vmul.f32 %v804_v11, %v282_v63 }
  0xc7   :  { %v234_v19 = vadd.f32 %v165_v60, %v138_v16 }
  0xcd   :  { %v854_v5 = vpop.permute.xlu2 %293 }
  0xce   :  { %v258_v51 = vpop.permute.xlu1 %257  ;;  %v180_v62 = vpop.permute.xlu0 %179 }
  0xcf   :  { %v315_v17 = vmul.f32 %v804_v11, %v258_v51  ;;  %v237_v34 = vadd.f32 %v180_v62, %v141_v30  ;;  %v351_v62 = vmax.f32 %v838_v27, 0.0 }
  0xd1   :  { %v331_v20 = vadd.f32 %v315_v17, %v234_v19  ;;  %v334_v42 = vadd.f32 %v318_v40, %v237_v34  ;;  %v354_v19 = vmax.f32 %v846_v49, 0.0 }
  0xd3   :  { %v347_v31 = vmax.f32 %v331_v20, 0.0  ;;  %v350_v55 = vmax.f32 %v334_v42, 0.0 }
  0xd6   :  { %v266_v0 = vpop.permute.xlu1 %265  ;;  %v195_v1 = vpop.permute.xlu0 %194 }
  0xd7   :  { %v390_v9 = vpop.permute.xlu2 %389  ;;  %v317_v38 = vmul.f32 %v804_v11, %v266_v0  ;;  %v240_v50 = vadd.f32 %v195_v1, %v144_v33  ;;  %v358_v33 = vmax.f32 %v826_v29, 0.0  ;;  %v495_v29 = vstv %s906_s4  ;;  %s583_s4 = smov [#allocation3]  }
  0xd8   :  { %v459_v36 = vmul.f32 %v390_v9, %v347_v31  ;;  %v324_v31 = vmul.f32 %v804_v11, %v854_v5  ;;  %s525_s12 = sshll.u32 %s583_s4, 4  ;;  %s526_s12 = int_to_ptr.vmem [resolvable:$true] %s525_s12 }
  0xd9   :  { %v333_v41 = vadd.f32 %v317_v38, %v786_v59  ;;  %v337_v51 = vadd.f32 %v321_v57, %v240_v50 }
  0xdb   :  { %v349_v48 = vmax.f32 %v333_v41, 0.0  ;;  %v353_v17 = vmax.f32 %v337_v51, 0.0 }
  0xde   :  { %v278_v6 = vpop.permute.xlu1 %277  ;;  %v856_v7 = vpop.permute.xlu0 %209 }
  0xdf   :  { %v400_v14 = vpop.permute.xlu2 %399  ;;  %v320_v45 = vmul.f32 %v804_v11, %v278_v6 }
  0xe0   :  { %v461_v52 = vmul.f32 %v400_v14, %v349_v48 }
  0xe1   :  { %v336_v59 = vadd.f32 %v320_v45, %v795_v2 }
  0xe3   :  { %v352_v8 = vmax.f32 %v336_v59, 0.0 }
  0xe6   :  { %v290_v10 = vpop.permute.xlu1 %289  ;;  %v859_v13 = vpop.permute.xlu0 %224 }
  0xe7   :  { %v415_v26 = vpop.permute.xlu2 %414  ;;  %v323_v3 = vmul.f32 %v804_v11, %v290_v10 }
  0xe8   :  { %v464_v16 = vmul.f32 %v415_v26, %v352_v8 }
  0xe9   :  { %v339_v27 = vadd.f32 %v323_v3, %v806_v12 }
  0xeb   :  { %v355_v38 = vmax.f32 %v339_v27, 0.0 }
  0xee   :  { %v380_v23 = vpop.permute.xlu0 %379 }
  0xef   :  { %v457_v25 = vmul.f32 %v380_v23, %v345_v22  ;;  %v385_v28 = vpop.permute.xlu1 %384  ;;  %v425_v18 = vpop.permute.xlu2 %424 }
  0xf0   :  { %v458_v32 = vmul.f32 %v385_v28, %v346_v24  ;;  %v466_v22 = vmul.f32 %v425_v18, %v354_v19 }
  0xf2   :  { %v473_v39 = vadd.f32 %v458_v32, %v457_v25  ;;  %v147_v25 = vmul.f32 %v774_v53, %v741_v37  ;;  %v150_v37 = vmul.f32 %v774_v53, %v756_v43 }
  0xf4   :  { %v474_v21 = vadd.f32 %v473_v39, %v459_v36  ;;  %v243_v28 = vadd.f32 %v856_v7, %v147_v25  ;;  %v246_v42 = vadd.f32 %v859_v13, %v150_v37 }
  0xf6   :  { %v405_v46 = vpop.permute.xlu0 %404  ;;  %v340_v15 = vadd.f32 %v324_v31, %v243_v28 }
  0xf7   :  { %v395_v47 = vpop.permute.xlu1 %394  ;;  %v462_v60 = vmul.f32 %v405_v46, %v350_v55 }
  0xf8   :  { %v460_v4 = vmul.f32 %v395_v47, %v348_v44  ;;  %v306_v14 = vpop.permute.xlu2 %305  ;;  %v356_v39 = vmax.f32 %v340_v15, 0.0 }
  0xf9   :  { %v327_v7 = vmul.f32 %v804_v11, %v306_v14 }
  0xfa   :  { %v475_v56 = vadd.f32 %v474_v21, %v460_v4 }
  0xfb   :  { %v343_v46 = vadd.f32 %v327_v7, %v246_v42 }
  0xfc   :  { %v476_v61 = vadd.f32 %v475_v56, %v461_v52 }
  0xfd   :  { %v359_v4 = vmax.f32 %v343_v46, 0.0 }
  0xfe   :  { %v477_v0 = vadd.f32 %v476_v61, %v462_v60  ;;  %v420_v9 = vpop.permute.xlu0 %419 }
  0xff   :  { %v410_v35 = vpop.permute.xlu1 %409  ;;  %v465_v20 = vmul.f32 %v420_v9, %v353_v17 }
 0x100   :  { %v463_v6 = vmul.f32 %v410_v35, %v351_v62  ;;  %v310_v36 = vpop.permute.xlu2 %309 }
 0x102   :  { %v478_v1 = vadd.f32 %v477_v0, %v463_v6 }
 0x104   :  { %v479_v63 = vadd.f32 %v478_v1, %v464_v16 }
 0x106   :  { %v480_v2 = vadd.f32 %v479_v63, %v465_v20  ;;  %v440_v21 = vpop.permute.xlu0 %439 }
 0x108   :  { %v298_v23 = vpop.permute.xlu1 %297  ;;  %v481_v24 = vadd.f32 %v480_v2, %v466_v22 }
 0x109   :  { %v325_v30 = vmul.f32 %v804_v11, %v298_v23  ;;  %v450_v45 = vpop.permute.xlu2 %449 }
 0x10a   :  { %v471_v53 = vmul.f32 %v450_v45, %v359_v4 }
 0x10b   :  { %v341_v10 = vadd.f32 %v325_v30, %v849_v54  ;;  %v328_v54 = vmul.f32 %v804_v11, %v310_v36 }
 0x10d   :  { %v357_v12 = vmax.f32 %v341_v10, 0.0  ;;  %v344_v43 = vadd.f32 %v328_v54, %v852_v58 }
 0x10f   :  { %v469_v44 = vmul.f32 %v440_v21, %v357_v12  ;;  %v360_v55 = vmax.f32 %v344_v43, 0.0 }
 0x111   :  { %v430_v49 = vpop.permute.xlu1 %429 }
 0x112   :  { %v467_v32 = vmul.f32 %v430_v49, %v355_v38 }
 0x114   :  { %v482_v34 = vadd.f32 %v481_v24, %v467_v32 }
 0x119   :  { %v435_v40 = vpop.permute.xlu1 %434 }
 0x11a   :  { %v468_v41 = vmul.f32 %v435_v40, %v356_v39 }
 0x11c   :  { %v483_v5 = vadd.f32 %v482_v34, %v468_v41 }
 0x11e   :  { %v484_v47 = vadd.f32 %v483_v5, %v469_v44 }
 0x121   :  { %v445_v48 = vpop.permute.xlu1 %444 }
 0x122   :  { %v470_v26 = vmul.f32 %v445_v48, %v358_v33 }
 0x124   :  { %v485_v50 = vadd.f32 %v484_v47, %v470_v26 }
 0x126   :  { %v486_v52 = vadd.f32 %v485_v50, %v471_v53 }
 0x129   :  { %v455_v56 = vpop.permute.xlu1 %454 }
 0x12a   :  { %v472_v13 = vmul.f32 %v455_v56, %v360_v55 }
 0x12c   :  { %v487_v57 = vadd.f32 %v486_v52, %v472_v13 }
 0x12e   :  { %v488_v59 = vrot.slane %v487_v57, 4 }
 0x130   :  { %v489_v60 = vadd.f32 %v488_v59, %v487_v57 }
 0x132   :  { %v490_v61 = vrot.slane %v489_v60, 2 }
 0x134   :  { %v491_v51 = vadd.f32 %v490_v61, %v489_v60 }
 0x136   :  { %v492_v11 = vrot.slane %v491_v51, 1 }
 0x138   :  { %v493_v62 = vadd.f32 %v492_v11, %v491_v51 }
 0x13a   :  { %v496_v0 = vadd.f32 %v495_v29, %v493_v62 }
 0x13c   :  { %v497_v35 = vand.u32 2147483647, %v496_v0  ;;  %vm516_vm4 = vcmp.ge.f32.partialorder %v496_v0, 0.0 }
 0x13e   :  { %v498_v58 = vsub.f32 0.0, %v497_v35 }
 0x140   :  { %v499_v8 = vmul.f32 1.442695, %v498_v58 }
 0x142   :  { %551 = vpow2.f32 %v499_v8 }
 0x148   :  { %v552_v6 = vpop.eup %551 }
 0x149   :  { %v501_v9 = vadd.f32 1.0, %v552_v6  ;;  %v517_v23 = vsel %vm516_vm4, 1.0, %v552_v6 }
 0x14b   :  { %553 = vrcp.f32 %v501_v9  ;;  %v513_v18 = vand.u32 2147483648, %v501_v9  ;;  %v511_v20 = vand.u32 2147483647, %v501_v9  ;;  %vm507_vm1 = vweird.f32 %v501_v9 }
 0x14d   :  { %v514_v22 = vor.u32 1.1754944e-38, %v513_v18  ;;  %vm512_vm3 = vcmp.eq.f32.partialorder %v511_v20, 8.507059e+37 }
 0x151   :  { %v554_v16 = vpop.eup %553 }
 0x152   :  { %v503_v17 = vmul.f32 %v554_v16, %v501_v9  ;;  %vm508_vm0 = vweird.f32 %v554_v16 }
 0x153   :  { %vm509_vm2 = vmor %vm507_vm1, %vm508_vm0 }
 0x154   :  { %v504_v1 = vsub.f32 1.0, %v503_v17 }
 0x156   :  { %v505_v19 = vmul.f32 %v554_v16, %v504_v1 }
 0x158   :  { %v506_v63 = vadd.f32 %v554_v16, %v505_v19 }
 0x15a   :  { %v510_v2 = vsel %vm509_vm2, %v554_v16, %v506_v63 }
 0x15b   :  { %v515_v3 = vsel %vm512_vm3, %v514_v22, %v510_v2 }
 0x15c   :  { %v518_v24 = vmul.f32 %v517_v23, %v515_v3 }
 0x15e   :  { %519 = vst [vmem:[#allocation3] sm:$0x1] %v518_v24 }
 0x15f   :  { %530 = dma.vmem_to_hbm [thread:$0]  %s526_s12, 16, %s528_s15, [#allocation4]  }
 0x160   :  { %579 = dma.done.wait [#allocation4], 16  }
 0x161   :  { %580 = vsyncadd [#allocation4], 4294967280 }
 0x162   :  { %535 = vsyncpa [#allocation4], 1 }

</bundles_post_ra>
